<compile_context>
chip_gen: v7x
topology: tpu7x:2x2x1
jax: 0.10.0
libtpu: 0.0.40
codegen_flags: <defaults>
</compile_context>

<pallas_src>
import functools
from math import sqrt, pi, log

import jax
import jax.numpy as jnp
from jax import lax
from jax.experimental import pallas as pl
from jax.experimental.pallas import tpu as pltpu


def _anomaly_attention_kernel(ndist_ref, q_ref, k_ref, v_ref, sig_ref,
                              v_out_ref, series_ref, prior_ref, sigma_ref,
                              *, scale):
    # Block views for one batch-block (Bb batches):
    #   q_ref:(Bb,H,L,E) bf16, k_ref:(Bb,H,S,E) bf16, v_ref:(Bb,H,S,D) bf16,
    #   sig_ref:(Bb,H,L) f32, ndist_ref:(L,S) f32 holding -0.5*|i-j|^2.
    Bb, H, L, E = q_ref.shape
    S = k_ref.shape[2]
    D = v_ref.shape[3]
    G = Bb * H

    ndist = ndist_ref[...]                                     # (L, S)

    # ---- sigma transform + prior (vectorized across Bb*H rows) -------------
    sig = sig_ref[...]                                         # (Bb, H, L)
    s = jax.nn.sigmoid(sig * 5.0) + 1e-5
    s = jnp.exp(s * jnp.float32(log(3.0))) - 1.0               # 3**s - 1
    sigma_ref[...] = s.astype(sigma_ref.dtype)

    inv_sig = pl.reciprocal(s)                                 # exact (keeps prior tight)
    coef = jnp.float32(1.0 / sqrt(2.0 * pi)) * inv_sig         # (Bb, H, L)
    inv_2s2 = inv_sig * inv_sig                                # -0.5 folded into ndist
    prior = coef[..., None] * jnp.exp(ndist[None, None] * inv_2s2[..., None])
    prior_ref[...] = prior.astype(prior_ref.dtype)             # bf16 store

    # ---- attention scores + softmax, batched over merged (Bb*H) ------------
    q2 = q_ref[...].reshape(G, L, E)
    k2 = k_ref[...].reshape(G, S, E)
    scores = lax.dot_general(
        q2, k2, dimension_numbers=(((2,), (2,)), ((0,), (0,))),
        preferred_element_type=jnp.float32) * jnp.float32(scale)   # (G, L, S)
    m = jnp.max(scores, axis=-1, keepdims=True)
    e = jnp.exp(scores - m)
    denom = jnp.sum(e, axis=-1, keepdims=True)
    series = e * pl.reciprocal(denom, approx=True)              # (G, L, S) f32
    series4 = series.reshape(Bb, H, L, S)
    series_ref[...] = series4.astype(series_ref.dtype)          # bf16 store

    # ---- series @ V per head, packed lane-dense as one (Bb, L, H*D) store --
    series_lp = series4.astype(v_ref.dtype)                     # bf16 MXU input
    v_all = v_ref[...]                                          # (Bb, H, S, D)
    chunks = []
    for h in range(H):                                          # H small & static
        v_h = lax.dot_general(
            series_lp[:, h], v_all[:, h],
            dimension_numbers=(((2,), (1,)), ((0,), (0,))),
            preferred_element_type=jnp.float32)                 # (Bb, L, D)
        chunks.append(v_h)
    v_out_ref[...] = jnp.concatenate(chunks, axis=-1).astype(v_out_ref.dtype)


def _pick_bb_and_vmem(B, H, L, S, E, D):
    """Largest divisor-of-B batch block whose in+out block bytes fit a
    conservative per-step budget (v7x-safe), plus an explicit VMEM limit."""
    per_b = (H * (L * E + S * E + S * D) * 2       # q, k, v (bf16)
             + H * L * 4                           # sigma in (f32)
             + L * H * D * 4                       # V out (f32)
             + 2 * H * L * S * 2                   # series + prior (bf16)
             + H * L * 4)                          # sigma out (f32)
    budget = 12 << 20                              # per-step block bytes (pre double-buffer)
    bb = 1
    for cand in range(1, min(B, 8) + 1):
        if B % cand == 0 and cand * per_b <= budget:
            bb = cand
    total = 2 * (bb * per_b + L * S * 4)           # double-buffered blocks + shared ndist
    vmem_limit = int(min(48 << 20, max(32 << 20, total + (8 << 20))))
    return bb, vmem_limit


def anomaly_attention(queries, keys, values, sigma, distances, scale=None):
    """Matches AnomalyAttention.forward (attention_dropout = 0.0).

    Returns (V:(B,L,H,D) f32, series:(B,H,L,S) bf16, prior:(B,H,L,S) bf16,
    sigma:(B,H,L,S) f32)."""
    B, L, H, E = queries.shape
    _, S, _, D = values.shape
    sc = float(scale) if scale is not None else 1.0 / sqrt(E)

    # Glue: head-major layout, bf16 matmul inputs, f32 elementwise inputs.
    q = jnp.transpose(queries, (0, 2, 1, 3)).astype(jnp.bfloat16)   # (B,H,L,E)
    k = jnp.transpose(keys, (0, 2, 1, 3)).astype(jnp.bfloat16)      # (B,H,S,E)
    v = jnp.transpose(values, (0, 2, 1, 3)).astype(jnp.bfloat16)    # (B,H,S,D)
    sig = jnp.transpose(sigma, (0, 2, 1)).astype(jnp.float32)       # (B,H,L)
    ndist = -0.5 * jnp.square(distances.astype(jnp.float32))        # (L,S)

    Bb, vmem_limit = _pick_bb_and_vmem(B, H, L, S, E, D)
    grid = (B // Bb,)

    kernel = functools.partial(_anomaly_attention_kernel, scale=sc)

    cost = pl.CostEstimate(
        flops=2 * B * H * L * S * (E + D),
        transcendentals=B * H * (2 * L * S + 4 * L),
        bytes_accessed=(L * S * 4
                        + B * H * (L * E + S * E + S * D) * 2
                        + B * H * L * 4
                        + B * L * H * D * 4
                        + 2 * B * H * L * S * 2
                        + B * H * L * 4),
    )

    v_flat, series, prior, sig_small = pl.pallas_call(
        kernel,
        out_shape=(
            jax.ShapeDtypeStruct((B, L, H * D), jnp.float32),     # V, lane-dense
            jax.ShapeDtypeStruct((B, H, L, S), jnp.bfloat16),     # series
            jax.ShapeDtypeStruct((B, H, L, S), jnp.bfloat16),     # prior
            jax.ShapeDtypeStruct((B, H, L), jnp.float32),         # sigma (row form)
        ),
        grid=grid,
        in_specs=[
            pl.BlockSpec((L, S), lambda b: (0, 0)),               # -0.5*dist^2, shared
            pl.BlockSpec((Bb, H, L, E), lambda b: (b, 0, 0, 0)),
            pl.BlockSpec((Bb, H, S, E), lambda b: (b, 0, 0, 0)),
            pl.BlockSpec((Bb, H, S, D), lambda b: (b, 0, 0, 0)),
            pl.BlockSpec((Bb, H, L), lambda b: (b, 0, 0)),
        ],
        out_specs=(
            pl.BlockSpec((Bb, L, H * D), lambda b: (b, 0, 0)),
            pl.BlockSpec((Bb, H, L, S), lambda b: (b, 0, 0, 0)),
            pl.BlockSpec((Bb, H, L, S), lambda b: (b, 0, 0, 0)),
            pl.BlockSpec((Bb, H, L), lambda b: (b, 0, 0)),
        ),
        compiler_params=pltpu.CompilerParams(
            dimension_semantics=("parallel",),
            vmem_limit_bytes=vmem_limit),
        cost_estimate=cost,
    )(ndist, q, k, v, sig)

    # Back to module output layouts.
    V = v_flat.reshape(B, L, H, D)                               # (B,L,H,D)
    # TODO(synk): downstream association-discrepancy loss only needs the
    # (B,H,L) row form of sigma; broadcast here only to match the module API.
    sigma_full = jnp.broadcast_to(sig_small[..., None], (B, H, L, S))
    return V, series, prior, sigma_full


def _reference(queries, keys, values, sigma, distances, scale=None):
    B, L, H, E = queries.shape
    sc = scale if scale is not None else 1.0 / sqrt(E)
    scores = jnp.einsum('blhe,bshe->bhls', queries, keys)
    series = jax.nn.softmax(sc * scores, axis=-1)
    V = jnp.einsum('bhls,bshd->blhd', series, values)
    sig = jnp.transpose(sigma, (0, 2, 1))
    ws = sig.shape[-1]
    sig = jax.nn.sigmoid(sig * 5.0) + 1e-5
    sig = jnp.power(3.0, sig) - 1.0
    sig = jnp.broadcast_to(sig[..., None], sig.shape + (ws,))
    pr = jnp.broadcast_to(distances[None, None], sig.shape)
    prior = 1.0 / (sqrt(2.0 * pi) * sig) * jnp.exp(-pr ** 2 / 2.0 / sig ** 2)
    return V, series, prior, sig


if __name__ == "__main__":
    # Small shapes consistent with the module: win_size = L = S = 8.
    B, L, H, E = 2, 8, 4, 32
    S, D = L, E
    win_size = L

    key = jax.random.PRNGKey(0)
    kq, kk, kv, ks = jax.random.split(key, 4)
    queries = jax.random.normal(kq, (B, L, H, E), dtype=jnp.float32)
    keys = jax.random.normal(kk, (B, S, H, E), dtype=jnp.float32)
    values = jax.random.normal(kv, (B, S, H, D), dtype=jnp.float32)
    sigma = jax.random.normal(ks, (B, L, H), dtype=jnp.float32)

    # Deterministic "parameter": the |i - j| distance matrix built in __init__.
    idx = jnp.arange(win_size, dtype=jnp.float32)
    distances = jnp.abs(idx[:, None] - idx[None, :])   # (win_size, win_size)

    V, series, prior, sig_out = anomaly_attention(queries, keys, values, sigma, distances)
    jax.block_until_ready((V, series, prior, sig_out))

    # Correctness check against a pure-JAX f32 reference of the PyTorch math.
    # bf16 q/k/v + bf16 series/prior outputs + approx EUP reciprocal => loosened
    # tolerances on V/series/prior; sigma path stays f32-exact.
    V_r, series_r, prior_r, sig_r = _reference(queries, keys, values, sigma, distances)
    assert jnp.allclose(V, V_r, atol=3e-2, rtol=3e-2)
    assert jnp.allclose(series.astype(jnp.float32), series_r, atol=2e-2, rtol=2e-2)
    assert jnp.allclose(prior.astype(jnp.float32), prior_r, atol=1e-2, rtol=2e-2)
    assert jnp.allclose(sig_out, sig_r, atol=1e-5, rtol=1e-5)

    print("KERNEL_OK")
</pallas_src>

<mosaic_0001>
module attributes {stable_mosaic.version = 11 : i64} {
  func.func @_anomaly_attention_kernel(%arg0: i32, %arg1: memref<8x8xf32, #tpu.memory_space<vmem>>, %arg2: memref<2x4x8x32xbf16, #tpu.memory_space<vmem>>, %arg3: memref<2x4x8x32xbf16, #tpu.memory_space<vmem>>, %arg4: memref<2x4x8x32xbf16, #tpu.memory_space<vmem>>, %arg5: memref<2x4x8xf32, #tpu.memory_space<vmem>>, %arg6: memref<2x8x128xf32, #tpu.memory_space<vmem>>, %arg7: memref<2x4x8x8xbf16, #tpu.memory_space<vmem>>, %arg8: memref<2x4x8x8xbf16, #tpu.memory_space<vmem>>, %arg9: memref<2x4x8xf32, #tpu.memory_space<vmem>>) attributes {dimension_semantics = [#tpu.dimension_semantics<parallel>], iteration_bounds = array<i64: 1>, scalar_prefetch = 0 : i64, scratch_operands = 0 : i64, tpu.core_type = #tpu.core_type<tc>, window_params = [{pipeline_mode = #tpu.pipeline_mode<synchronous>, transform_indices = @transform_0, window_bounds = array<i64: 8, 8>}, {transform_indices = @transform_1, window_bounds = array<i64: 2, 4, 8, 32>}, {transform_indices = @transform_2, window_bounds = array<i64: 2, 4, 8, 32>}, {transform_indices = @transform_3, window_bounds = array<i64: 2, 4, 8, 32>}, {transform_indices = @transform_4, window_bounds = array<i64: 2, 4, 8>}, {transform_indices = @transform_5, window_bounds = array<i64: 2, 8, 128>}, {transform_indices = @transform_6, window_bounds = array<i64: 2, 4, 8, 8>}, {transform_indices = @transform_7, window_bounds = array<i64: 2, 4, 8, 8>}, {transform_indices = @transform_8, window_bounds = array<i64: 2, 4, 8>}]} {
    %c0 = arith.constant 0 : index
    %c0_0 = arith.constant 0 : index
    %0 = vector.load %arg1[%c0, %c0_0] : memref<8x8xf32, #tpu.memory_space<vmem>>, vector<8x8xf32>
    %c0_1 = arith.constant 0 : index
    %c0_2 = arith.constant 0 : index
    %c0_3 = arith.constant 0 : index
    %1 = vector.load %arg5[%c0_1, %c0_2, %c0_3] : memref<2x4x8xf32, #tpu.memory_space<vmem>>, vector<2x4x8xf32>
    %cst = arith.constant 5.000000e+00 : f32
    %2 = vector.broadcast %cst : f32 to vector<2x4x8xf32>
    %3 = arith.mulf %1, %2 : vector<2x4x8xf32>
    %4 = arith.negf %3 : vector<2x4x8xf32>
    %5 = math.exp %4 : vector<2x4x8xf32>
    %cst_4 = arith.constant 1.000000e+00 : f32
    %6 = vector.broadcast %cst_4 : f32 to vector<2x4x8xf32>
    %7 = arith.addf %6, %5 : vector<2x4x8xf32>
    %8 = arith.divf %6, %7 : vector<2x4x8xf32>
    %cst_5 = arith.constant 9.99999974E-6 : f32
    %9 = vector.broadcast %cst_5 : f32 to vector<2x4x8xf32>
    %10 = arith.addf %8, %9 : vector<2x4x8xf32>
    %cst_6 = arith.constant 1.09861231 : f32
    %11 = vector.broadcast %cst_6 : f32 to vector<2x4x8xf32>
    %12 = arith.mulf %10, %11 : vector<2x4x8xf32>
    %13 = math.exp %12 : vector<2x4x8xf32>
    %cst_7 = arith.constant 1.000000e+00 : f32
    %14 = vector.broadcast %cst_7 : f32 to vector<2x4x8xf32>
    %15 = arith.subf %13, %14 : vector<2x4x8xf32>
    %c0_8 = arith.constant 0 : index
    %c0_9 = arith.constant 0 : index
    %c0_10 = arith.constant 0 : index
    %16 = vector.load %arg9[%c0_8, %c0_9, %c0_10] : memref<2x4x8xf32, #tpu.memory_space<vmem>>, vector<2x4x8xf32>
    tpu.vector_store %arg9[%c0_8, %c0_9, %c0_10], %15 {strides = array<i32>} : memref<2x4x8xf32, #tpu.memory_space<vmem>>, vector<2x4x8xf32>,
    %17 = tpu.reciprocal %15 : vector<2x4x8xf32> -> vector<2x4x8xf32>
    %cst_11 = arith.constant 0.398942292 : f32
    %18 = vector.broadcast %cst_11 : f32 to vector<2x4x8xf32>
    %19 = arith.mulf %18, %17 : vector<2x4x8xf32>
    %20 = arith.mulf %17, %17 : vector<2x4x8xf32>
    %21 = vector.shape_cast %19 : vector<2x4x8xf32> to vector<2x4x8x1xf32>
    %22 = vector.shape_cast %0 : vector<8x8xf32> to vector<1x1x8x8xf32>
    %23 = vector.shape_cast %20 : vector<2x4x8xf32> to vector<2x4x8x1xf32>
    %24 = vector.broadcast %22 : vector<1x1x8x8xf32> to vector<2x4x8x8xf32>
    %25 = vector.broadcast %23 : vector<2x4x8x1xf32> to vector<2x4x8x8xf32>
    %26 = arith.mulf %24, %25 : vector<2x4x8x8xf32>
    %27 = math.exp %26 : vector<2x4x8x8xf32>
    %28 = vector.broadcast %21 : vector<2x4x8x1xf32> to vector<2x4x8x8xf32>
    %29 = arith.mulf %28, %27 : vector<2x4x8x8xf32>
    %30 = arith.truncf %29 : vector<2x4x8x8xf32> to vector<2x4x8x8xbf16>
    %c0_12 = arith.constant 0 : index
    %c0_13 = arith.constant 0 : index
    %c0_14 = arith.constant 0 : index
    %c0_15 = arith.constant 0 : index
    %31 = vector.load %arg8[%c0_12, %c0_13, %c0_14, %c0_15] : memref<2x4x8x8xbf16, #tpu.memory_space<vmem>>, vector<2x4x8x8xbf16>
    tpu.vector_store %arg8[%c0_12, %c0_13, %c0_14, %c0_15], %30 {strides = array<i32>} : memref<2x4x8x8xbf16, #tpu.memory_space<vmem>>, vector<2x4x8x8xbf16>,
    %c0_16 = arith.constant 0 : index
    %c0_17 = arith.constant 0 : index
    %c0_18 = arith.constant 0 : index
    %c0_19 = arith.constant 0 : index
    %32 = vector.load %arg2[%c0_16, %c0_17, %c0_18, %c0_19] : memref<2x4x8x32xbf16, #tpu.memory_space<vmem>>, vector<2x4x8x32xbf16>
    %33 = vector.shape_cast %32 : vector<2x4x8x32xbf16> to vector<8x8x32xbf16>
    %c0_20 = arith.constant 0 : index
    %c0_21 = arith.constant 0 : index
    %c0_22 = arith.constant 0 : index
    %c0_23 = arith.constant 0 : index
    %34 = vector.load %arg3[%c0_20, %c0_21, %c0_22, %c0_23] : memref<2x4x8x32xbf16, #tpu.memory_space<vmem>>, vector<2x4x8x32xbf16>
    %35 = vector.shape_cast %34 : vector<2x4x8x32xbf16> to vector<8x8x32xbf16>
    %cst_24 = arith.constant dense<0.000000e+00> : vector<8x8x8xf32>
    %36 = tpu.matmul %33, %35, %cst_24 {dimension_numbers = #tpu.dot_dimension_numbers<[2], [2], [1], [1], [0, 0, 0, 1, 1, 1], [0], [0]>} : vector<8x8x32xbf16>, vector<8x8x32xbf16>, vector<8x8x8xf32> -> vector<8x8x8xf32>
    %cst_25 = arith.constant 0.176776692 : f32
    %37 = vector.broadcast %cst_25 : f32 to vector<8x8x8xf32>
    %38 = arith.mulf %36, %37 : vector<8x8x8xf32>
    %cst_26 = arith.constant dense<0xFF800000> : vector<8x8xf32>
    %39 = vector.multi_reduction <maximumf>, %38, %cst_26 [2] : vector<8x8x8xf32> to vector<8x8xf32>
    %40 = vector.shape_cast %39 : vector<8x8xf32> to vector<8x8x1xf32>
    %41 = vector.broadcast %40 : vector<8x8x1xf32> to vector<8x8x8xf32>
    %42 = arith.subf %38, %41 : vector<8x8x8xf32>
    %43 = math.exp %42 : vector<8x8x8xf32>
    %cst_27 = arith.constant dense<0.000000e+00> : vector<8x8xf32>
    %44 = vector.multi_reduction <add>, %43, %cst_27 [2] : vector<8x8x8xf32> to vector<8x8xf32>
    %45 = vector.shape_cast %44 : vector<8x8xf32> to vector<8x8x1xf32>
    %46 = tpu.reciprocal %45 {approx = true} : vector<8x8x1xf32> -> vector<8x8x1xf32>
    %47 = vector.broadcast %46 : vector<8x8x1xf32> to vector<8x8x8xf32>
    %48 = arith.mulf %43, %47 : vector<8x8x8xf32>
    %49 = vector.shape_cast %48 : vector<8x8x8xf32> to vector<2x4x8x8xf32>
    %50 = arith.truncf %49 : vector<2x4x8x8xf32> to vector<2x4x8x8xbf16>
    %c0_28 = arith.constant 0 : index
    %c0_29 = arith.constant 0 : index
    %c0_30 = arith.constant 0 : index
    %c0_31 = arith.constant 0 : index
    %51 = vector.load %arg7[%c0_28, %c0_29, %c0_30, %c0_31] : memref<2x4x8x8xbf16, #tpu.memory_space<vmem>>, vector<2x4x8x8xbf16>
    tpu.vector_store %arg7[%c0_28, %c0_29, %c0_30, %c0_31], %50 {strides = array<i32>} : memref<2x4x8x8xbf16, #tpu.memory_space<vmem>>, vector<2x4x8x8xbf16>,
    %52 = arith.truncf %49 : vector<2x4x8x8xf32> to vector<2x4x8x8xbf16>
    %c0_32 = arith.constant 0 : index
    %c0_33 = arith.constant 0 : index
    %c0_34 = arith.constant 0 : index
    %c0_35 = arith.constant 0 : index
    %53 = vector.load %arg4[%c0_32, %c0_33, %c0_34, %c0_35] : memref<2x4x8x32xbf16, #tpu.memory_space<vmem>>, vector<2x4x8x32xbf16>
    %54 = vector.extract_strided_slice %52 {offsets = [0, 0, 0, 0], sizes = [2, 1, 8, 8], strides = [1, 1, 1, 1]} : vector<2x4x8x8xbf16> to vector<2x1x8x8xbf16>
    %55 = vector.shape_cast %54 : vector<2x1x8x8xbf16> to vector<2x8x8xbf16>
    %56 = vector.extract_strided_slice %53 {offsets = [0, 0, 0, 0], sizes = [2, 1, 8, 32], strides = [1, 1, 1, 1]} : vector<2x4x8x32xbf16> to vector<2x1x8x32xbf16>
    %57 = vector.shape_cast %56 : vector<2x1x8x32xbf16> to vector<2x8x32xbf16>
    %cst_36 = arith.constant dense<0.000000e+00> : vector<2x8x32xf32>
    %58 = tpu.matmul %55, %57, %cst_36 {dimension_numbers = #tpu.dot_dimension_numbers<[2], [1], [1], [2], [0, 0, 0, 1, 1, 2], [0], [0]>} : vector<2x8x8xbf16>, vector<2x8x32xbf16>, vector<2x8x32xf32> -> vector<2x8x32xf32>
    %59 = vector.extract_strided_slice %52 {offsets = [0, 1, 0, 0], sizes = [2, 1, 8, 8], strides = [1, 1, 1, 1]} : vector<2x4x8x8xbf16> to vector<2x1x8x8xbf16>
    %60 = vector.shape_cast %59 : vector<2x1x8x8xbf16> to vector<2x8x8xbf16>
    %61 = vector.extract_strided_slice %53 {offsets = [0, 1, 0, 0], sizes = [2, 1, 8, 32], strides = [1, 1, 1, 1]} : vector<2x4x8x32xbf16> to vector<2x1x8x32xbf16>
    %62 = vector.shape_cast %61 : vector<2x1x8x32xbf16> to vector<2x8x32xbf16>
    %cst_37 = arith.constant dense<0.000000e+00> : vector<2x8x32xf32>
    %63 = tpu.matmul %60, %62, %cst_37 {dimension_numbers = #tpu.dot_dimension_numbers<[2], [1], [1], [2], [0, 0, 0, 1, 1, 2], [0], [0]>} : vector<2x8x8xbf16>, vector<2x8x32xbf16>, vector<2x8x32xf32> -> vector<2x8x32xf32>
    %64 = vector.extract_strided_slice %52 {offsets = [0, 2, 0, 0], sizes = [2, 1, 8, 8], strides = [1, 1, 1, 1]} : vector<2x4x8x8xbf16> to vector<2x1x8x8xbf16>
    %65 = vector.shape_cast %64 : vector<2x1x8x8xbf16> to vector<2x8x8xbf16>
    %66 = vector.extract_strided_slice %53 {offsets = [0, 2, 0, 0], sizes = [2, 1, 8, 32], strides = [1, 1, 1, 1]} : vector<2x4x8x32xbf16> to vector<2x1x8x32xbf16>
    %67 = vector.shape_cast %66 : vector<2x1x8x32xbf16> to vector<2x8x32xbf16>
    %cst_38 = arith.constant dense<0.000000e+00> : vector<2x8x32xf32>
    %68 = tpu.matmul %65, %67, %cst_38 {dimension_numbers = #tpu.dot_dimension_numbers<[2], [1], [1], [2], [0, 0, 0, 1, 1, 2], [0], [0]>} : vector<2x8x8xbf16>, vector<2x8x32xbf16>, vector<2x8x32xf32> -> vector<2x8x32xf32>
    %69 = vector.extract_strided_slice %52 {offsets = [0, 3, 0, 0], sizes = [2, 1, 8, 8], strides = [1, 1, 1, 1]} : vector<2x4x8x8xbf16> to vector<2x1x8x8xbf16>
    %70 = vector.shape_cast %69 : vector<2x1x8x8xbf16> to vector<2x8x8xbf16>
    %71 = vector.extract_strided_slice %53 {offsets = [0, 3, 0, 0], sizes = [2, 1, 8, 32], strides = [1, 1, 1, 1]} : vector<2x4x8x32xbf16> to vector<2x1x8x32xbf16>
    %72 = vector.shape_cast %71 : vector<2x1x8x32xbf16> to vector<2x8x32xbf16>
    %cst_39 = arith.constant dense<0.000000e+00> : vector<2x8x32xf32>
    %73 = tpu.matmul %70, %72, %cst_39 {dimension_numbers = #tpu.dot_dimension_numbers<[2], [1], [1], [2], [0, 0, 0, 1, 1, 2], [0], [0]>} : vector<2x8x8xbf16>, vector<2x8x32xbf16>, vector<2x8x32xf32> -> vector<2x8x32xf32>
    %74 = tpu.concatenate %58, %63, %68, %73 in 2 : vector<2x8x32xf32>, vector<2x8x32xf32>, vector<2x8x32xf32>, vector<2x8x32xf32> -> vector<2x8x128xf32>
    %c0_40 = arith.constant 0 : index
    %c0_41 = arith.constant 0 : index
    %c0_42 = arith.constant 0 : index
    %75 = vector.load %arg6[%c0_40, %c0_41, %c0_42] : memref<2x8x128xf32, #tpu.memory_space<vmem>>, vector<2x8x128xf32>
    tpu.vector_store %arg6[%c0_40, %c0_41, %c0_42], %74 {strides = array<i32>} : memref<2x8x128xf32, #tpu.memory_space<vmem>>, vector<2x8x128xf32>,
    return
  }
  func.func @transform_0(%arg0: i32) -> (i32, i32) {
    %c0_i32 = arith.constant 0 : i32
    %c0_i32_0 = arith.constant 0 : i32
    %c0_i32_1 = arith.constant 0 : i32
    return %c0_i32, %c0_i32_0 : i32, i32
  }
  func.func @transform_1(%arg0: i32) -> (i32, i32, i32, i32) {
    %c0_i32 = arith.constant 0 : i32
    %c0_i32_0 = arith.constant 0 : i32
    %c0_i32_1 = arith.constant 0 : i32
    %c0_i32_2 = arith.constant 0 : i32
    return %arg0, %c0_i32, %c0_i32_0, %c0_i32_1 : i32, i32, i32, i32
  }
  func.func @transform_2(%arg0: i32) -> (i32, i32, i32, i32) {
    %c0_i32 = arith.constant 0 : i32
    %c0_i32_0 = arith.constant 0 : i32
    %c0_i32_1 = arith.constant 0 : i32
    %c0_i32_2 = arith.constant 0 : i32
    return %arg0, %c0_i32, %c0_i32_0, %c0_i32_1 : i32, i32, i32, i32
  }
  func.func @transform_3(%arg0: i32) -> (i32, i32, i32, i32) {
    %c0_i32 = arith.constant 0 : i32
    %c0_i32_0 = arith.constant 0 : i32
    %c0_i32_1 = arith.constant 0 : i32
    %c0_i32_2 = arith.constant 0 : i32
    return %arg0, %c0_i32, %c0_i32_0, %c0_i32_1 : i32, i32, i32, i32
  }
  func.func @transform_4(%arg0: i32) -> (i32, i32, i32) {
    %c0_i32 = arith.constant 0 : i32
    %c0_i32_0 = arith.constant 0 : i32
    %c0_i32_1 = arith.constant 0 : i32
    return %arg0, %c0_i32, %c0_i32_0 : i32, i32, i32
  }
  func.func @transform_5(%arg0: i32) -> (i32, i32, i32) {
    %c0_i32 = arith.constant 0 : i32
    %c0_i32_0 = arith.constant 0 : i32
    %c0_i32_1 = arith.constant 0 : i32
    return %arg0, %c0_i32, %c0_i32_0 : i32, i32, i32
  }
  func.func @transform_6(%arg0: i32) -> (i32, i32, i32, i32) {
    %c0_i32 = arith.constant 0 : i32
    %c0_i32_0 = arith.constant 0 : i32
    %c0_i32_1 = arith.constant 0 : i32
    %c0_i32_2 = arith.constant 0 : i32
    return %arg0, %c0_i32, %c0_i32_0, %c0_i32_1 : i32, i32, i32, i32
  }
  func.func @transform_7(%arg0: i32) -> (i32, i32, i32, i32) {
    %c0_i32 = arith.constant 0 : i32
    %c0_i32_0 = arith.constant 0 : i32
    %c0_i32_1 = arith.constant 0 : i32
    %c0_i32_2 = arith.constant 0 : i32
    return %arg0, %c0_i32, %c0_i32_0, %c0_i32_1 : i32, i32, i32, i32
  }
  func.func @transform_8(%arg0: i32) -> (i32, i32, i32) {
    %c0_i32 = arith.constant 0 : i32
    %c0_i32_0 = arith.constant 0 : i32
    %c0_i32_1 = arith.constant 0 : i32
    return %arg0, %c0_i32, %c0_i32_0 : i32, i32, i32
  }
}

</mosaic_0001>

<bundles_post_ra>
// kernel: tpu_custom_call.1
= control target key start
LH: loop header
LB: loop body
LE: loop exit
PB: predicated region body
PF: predicated region fallthrough
CT: control target
= control target key end

     0   :  { %14 = vsyncpa [#allocation3], 0  ;;  %s2048_s0 = inlined_call_operand.hbm [shape: f32[8,8], index: 0, kind: input, shape index: {}]   ;;  %s2049_s1 = inlined_call_operand.hbm [shape: bf16[2,4,8,32], index: 1, kind: input, shape index: {}]   ;;  %s2050_s2 = inlined_call_operand.hbm [shape: bf16[2,4,8,32], index: 2, kind: input, shape index: {}]   ;;  %s2051_s3 = inlined_call_operand.hbm [shape: bf16[2,4,8,32], index: 3, kind: input, shape index: {}]   ;;  %s2052_s4 = inlined_call_operand.vmem [shape: f32[2,4,8], index: 4, kind: input, shape index: {}]   ;;  %s2053_s5 = inlined_call_operand.hbm [shape: f32[2,8,128], index: 5, kind: output, shape index: {0}]   ;;  %s2054_s6 = inlined_call_operand.hbm [shape: bf16[2,4,8,8], index: 6, kind: output, shape index: {1}]   ;;  %s2055_s7 = inlined_call_operand.hbm [shape: bf16[2,4,8,8], index: 7, kind: output, shape index: {2}]   ;;  %s2056_s8 = inlined_call_operand.hbm [shape: f32[2,4,8], index: 8, kind: output, shape index: {3}]  }
   0x1   :  { %15 = vsyncpa [#allocation6], 0 }
   0x2   :  { %16 = vsyncpa [#allocation9], 0 }
   0x3   :  { %17 = vsyncpa [#allocation4], 0 }
   0x4   :  { %18 = vsyncpa [#allocation12], 0 }
   0x5   :  { %19 = vsyncpa [#allocation15], 0  ;;  %s1668_s27 = smov [#allocation5]   ;;  %s1480_s9 = scalar_lea.hbm %s2049_s1, 512 }
   0x6   :  { %s35_s28 = sshll.u32 %s1668_s27, 4  ;;  %p1481_p0 = scmp.ne.s32.totalorder %s2049_s1, %s1480_s9  ;;  %s36_s28 = int_to_ptr.vmem [resolvable:$true] %s35_s28 }
   0x7   :  { %p1484_p1 = scmp.lt.u32.totalorder %s1480_s9, %s2049_s1 }
   0x9   :  { %p1486_p2 = pnand %p1484_p1, %p1481_p0 }
   0xb   :  { %1489 = shalt.err (!%p1486_p2)
}
   0xc   :  { %s1490_s14 = scalar_lea.vmem %s36_s28, 512  ;;  %p1495_p4 = scmp.lt.s32.totalorder %s36_s28, %s36_s28 }
   0xd   :  { %p1491_p3 = scmp.ne.s32.totalorder %s36_s28, %s1490_s14  ;;  %p1496_p5 = scmp.lt.s32.totalorder %s1490_s14, %s1490_s14 }
   0xf   :  { %p1497_p6 = por %p1496_p5, %p1495_p4 }
  0x11   :  { %p1498_p7 = pnand %p1497_p6, %p1491_p3 }
  0x13   :  { %1501 = shalt.err (!%p1498_p7)
}
  0x14   :  { %s1669_s15 = smov 64   ;;  %s1670_s16 = smov 4  }
  0x15   :  { %41 = dma.hbm_to_vmem [thread:$0]  %s2049_s1, 512, %s36_s28, [#allocation6], %s1669_s15, %s1669_s15, %s1670_s16  }
  0x16   :  { %s1671_s19 = smov [#allocation2]   ;;  %s1672_s21 = smov [#allocation7]  }
  0x17   :  { %s26_s20 = sshll.u32 %s1671_s19, 4  ;;  %s47_s22 = sshll.u32 %s1672_s21, 4  ;;  %s27_s20 = int_to_ptr.vmem [resolvable:$true] %s26_s20  ;;  %s48_s22 = int_to_ptr.vmem [resolvable:$true] %s47_s22 }
  0x18   :  { %s1502_s25 = scalar_lea.hbm %s2048_s0, 128 }
  0x19   :  { %p1503_p8 = scmp.ne.s32.totalorder %s2048_s0, %s1502_s25  ;;  %p1506_p9 = scmp.lt.u32.totalorder %s1502_s25, %s2048_s0 }
  0x1b   :  { %p1508_p10 = pnand %p1506_p9, %p1503_p8 }
  0x1d   :  { %1511 = shalt.err (!%p1508_p10)
}
  0x1e   :  { %s1512_s1 = scalar_lea.vmem %s27_s20, 128  ;;  %p1517_p12 = scmp.lt.s32.totalorder %s27_s20, %s27_s20 }
  0x1f   :  { %p1513_p11 = scmp.ne.s32.totalorder %s27_s20, %s1512_s1  ;;  %p1518_p13 = scmp.lt.s32.totalorder %s1512_s1, %s1512_s1 }
  0x21   :  { %p1519_p0 = por %p1518_p13, %p1517_p12 }
  0x23   :  { %p1520_p1 = pnand %p1519_p0, %p1513_p11 }
  0x25   :  { %1523 = shalt.err (!%p1520_p1)
}
  0x26   :  { %29 = dma.hbm_to_vmem [thread:$0]  %s2048_s0, 128, %s27_s20, [#allocation3]  }
  0x27   :  { %s1524_s12 = scalar_lea.hbm %s2050_s2, 512 }
  0x28   :  { %p1525_p2 = scmp.ne.s32.totalorder %s2050_s2, %s1524_s12  ;;  %p1528_p3 = scmp.lt.u32.totalorder %s1524_s12, %s2050_s2 }
  0x2a   :  { %p1530_p4 = pnand %p1528_p3, %p1525_p2 }
  0x2c   :  { %1533 = shalt.err (!%p1530_p4)
}
  0x2d   :  { %s1534_s19 = scalar_lea.vmem %s48_s22, 512  ;;  %p1539_p6 = scmp.lt.s32.totalorder %s48_s22, %s48_s22 }
  0x2e   :  { %p1535_p5 = scmp.ne.s32.totalorder %s48_s22, %s1534_s19  ;;  %p1540_p7 = scmp.lt.s32.totalorder %s1534_s19, %s1534_s19 }
  0x30   :  { %p1541_p8 = por %p1540_p7, %p1539_p6 }
  0x32   :  { %p1542_p9 = pnand %p1541_p8, %p1535_p5 }
  0x34   :  { %1545 = shalt.err (!%p1542_p9)
}
  0x35   :  { %53 = dma.hbm_to_vmem [thread:$0]  %s2050_s2, 512, %s48_s22, [#allocation6], %s1669_s15, %s1669_s15, %s1670_s16  }
  0x36   :  { %s1673_s21 = smov [#allocation8]   ;;  %s1546_s26 = scalar_lea.hbm %s2051_s3, 512 }
  0x37   :  { %s59_s23 = sshll.u32 %s1673_s21, 4  ;;  %p1547_p10 = scmp.ne.s32.totalorder %s2051_s3, %s1546_s26  ;;  %s60_s23 = int_to_ptr.vmem [resolvable:$true] %s59_s23 }
  0x38   :  { %p1550_p11 = scmp.lt.u32.totalorder %s1546_s26, %s2051_s3 }
  0x3a   :  { %p1552_p12 = pnand %p1550_p11, %p1547_p10 }
  0x3c   :  { %1555 = shalt.err (!%p1552_p12)
}
  0x3d   :  { %s1556_s28 = scalar_lea.vmem %s60_s23, 512  ;;  %p1561_p0 = scmp.lt.s32.totalorder %s60_s23, %s60_s23 }
  0x3e   :  { %p1557_p13 = scmp.ne.s32.totalorder %s60_s23, %s1556_s28  ;;  %p1562_p1 = scmp.lt.s32.totalorder %s1556_s28, %s1556_s28 }
  0x40   :  { %p1563_p2 = por %p1562_p1, %p1561_p0 }
  0x42   :  { %p1564_p3 = pnand %p1563_p2, %p1557_p13 }
  0x44   :  { %1567 = shalt.err (!%p1564_p3)
}
  0x45   :  { %65 = dma.hbm_to_vmem [thread:$0]  %s2051_s3, 512, %s60_s23, [#allocation9], %s1669_s15, %s1669_s15, %s1670_s16  }
  0x46   :  { %1656 = dma.done.wait [#allocation3], 128  }
  0x47   :  { %1657 = vsyncadd [#allocation3], 4294967168 }
  0x48   :  { %1658 = dma.done.wait [#allocation6], 1024  }
  0x49   :  { %1659 = vsyncadd [#allocation6], 4294966272 }
  0x4a   :  { %1660 = dma.done.wait [#allocation9], 512  }
  0x4b   :  { %1661 = vsyncadd [#allocation9], 4294966784  ;;  %v1674_v0 = vmov 0.0   ;;  %vm1675_vm0 = vmmov 0   ;;  %vm293_vm1 = vcmask 261120   ;;  %vm670_vm2 = vcmask 64512  }
  0x4c   :  { %1304 = vmatprep.subr.bf16.mxu0 %v1674_v0  ;;  %1310 = vmatprep.subr.bf16.mxu1 %v1674_v0  ;;  %v285_v1 = vld [vmem:[#allocation7] sm:$0xf]  ;;  %v286_v2 = vld [vmem:[#allocation7 + $0x4] sm:$0xf]  ;;  %v287_v5 = vld [vmem:[#allocation7 + $0x8] sm:$0xf] }
  0x4d   :  { %1306 = vmatprep.mubr.msk.bf16.mxu0 %vm1675_vm0, %v1674_v0  ;;  %1312 = vmatprep.mubr.msk.bf16.mxu1 %vm1675_vm0, %v1674_v0  ;;  %v298_v3 = vsel %vm293_vm1, %v285_v1, 0  ;;  %v344_v4 = vsel %vm293_vm1, %v286_v2, 0  ;;  %v288_v6 = vld [vmem:[#allocation7 + $0xc] sm:$0xf]  ;;  %v277_v7 = vld [vmem:[#allocation5] sm:$0xf] }
  0x4e   :  { %1305 = vmatpush3.bf16.xpose.msra.mxu0 %v298_v3  ;;  %1311 = vmatpush3.bf16.xpose.msra.mxu1 %v344_v4  ;;  %v278_v8 = vld [vmem:[#allocation5 + $0x4] sm:$0xf]  ;;  %v390_v9 = vsel %vm293_vm1, %v287_v5, 0  ;;  %v436_v10 = vsel %vm293_vm1, %v288_v6, 0  ;;  %v289_v11 = vld [vmem:[#allocation7 + $0x10] sm:$0xf] }
  0x4f   :  { %1316 = vmatprep.subr.bf16.mxu0 %v1674_v0  ;;  %1322 = vmatprep.subr.bf16.mxu1 %v1674_v0  ;;  %v290_v12 = vld [vmem:[#allocation7 + $0x14] sm:$0xf]  ;;  %v279_v13 = vld [vmem:[#allocation5 + $0x8] sm:$0xf]  ;;  %v280_v14 = vld [vmem:[#allocation5 + $0xc] sm:$0xf] }
  0x50   :  { %v482_v15 = vsel %vm293_vm1, %v289_v11, 0  ;;  %v528_v16 = vsel %vm293_vm1, %v290_v12, 0  ;;  %v291_v17 = vld [vmem:[#allocation7 + $0x18] sm:$0xf]  ;;  %v292_v18 = vld [vmem:[#allocation7 + $0x1c] sm:$0xf] }
  0x51   :  { %v281_v19 = vld [vmem:[#allocation5 + $0x10] sm:$0xf]  ;;  %v282_v20 = vld [vmem:[#allocation5 + $0x14] sm:$0xf]  ;;  %v574_v21 = vsel %vm293_vm1, %v291_v17, 0  ;;  %v620_v22 = vsel %vm293_vm1, %v292_v18, 0 }
  0x52   :  { %v283_v23 = vld [vmem:[#allocation5 + $0x18] sm:$0xf]  ;;  %v284_v24 = vld [vmem:[#allocation5 + $0x1c] sm:$0xf]  ;;  %vm786_vm3 = vcmask 1043456   ;;  %vm108_vm4 = vcmask 60416  }
  0x53   :  { %s1677_s12 = smov [#allocation11]   ;;  %s1678_s14 = smov 96  }
  0x54   :  { %s1203_s13 = sshll.u32 %s1677_s12, 4  ;;  %s1204_s13 = int_to_ptr.vmem [resolvable:$true] %s1203_s13 }
  0x55   :  { %1307 = vmatmul.mubr.msk.bf16.vlgmr.msra.gmra.mrb[0].mxu0 %vm293_vm1, %v277_v7  ;;  %1313 = vmatmul.mubr.msk.bf16.vlgmr.msra.gmra.mrb[0].mxu1 %vm293_vm1, %v278_v8  ;;  %s1568_s17 = scalar_lea.vmem %s1204_s13, 512  ;;  %p1573_p5 = scmp.lt.s32.totalorder %s1204_s13, %s1204_s13 }
  0x56   :  { %1317 = vmatpush3.bf16.xpose.msra.mxu0 %v390_v9  ;;  %1323 = vmatpush3.bf16.xpose.msra.mxu1 %v436_v10  ;;  %p1569_p4 = scmp.ne.s32.totalorder %s1204_s13, %s1568_s17  ;;  %p1574_p6 = scmp.lt.s32.totalorder %s1568_s17, %s1568_s17 }
  0x57   :  { %1318 = vmatprep.mubr.msk.bf16.mxu0 %vm1675_vm0, %v1674_v0  ;;  %1324 = vmatprep.mubr.msk.bf16.mxu1 %vm1675_vm0, %v1674_v0 }
  0x58   :  { %1328 = vmatprep.subr.bf16.mxu0 %v1674_v0  ;;  %1334 = vmatprep.subr.bf16.mxu1 %v1674_v0  ;;  %p1575_p7 = por %p1574_p6, %p1573_p5 }
  0x5a   :  { %p1576_p8 = pnand %p1575_p7, %p1569_p4 }
  0x5d   :  { %1319 = vmatmul.mubr.msk.bf16.vlgmr.msra.gmra.mrb[4].mxu0 %vm293_vm1, %v279_v13  ;;  %1325 = vmatmul.mubr.msk.bf16.vlgmr.msra.gmra.mrb[4].mxu1 %vm293_vm1, %v280_v14 }
  0x5e   :  { %1329 = vmatpush3.bf16.xpose.msra.mxu0 %v482_v15  ;;  %1335 = vmatpush3.bf16.xpose.msra.mxu1 %v528_v16 }
  0x5f   :  { %1330 = vmatprep.mubr.msk.bf16.mxu0 %vm1675_vm0, %v1674_v0  ;;  %1336 = vmatprep.mubr.msk.bf16.mxu1 %vm1675_vm0, %v1674_v0 }
  0x60   :  { %1340 = vmatprep.subr.bf16.mxu0 %v1674_v0  ;;  %1346 = vmatprep.subr.bf16.mxu1 %v1674_v0 }
  0x65   :  { %1331 = vmatmul.mubr.msk.bf16.vlgmr.msra.gmra.mrb[8].mxu0 %vm293_vm1, %v281_v19  ;;  %1337 = vmatmul.mubr.msk.bf16.vlgmr.msra.gmra.mrb[8].mxu1 %vm293_vm1, %v282_v20 }
  0x66   :  { %1341 = vmatpush3.bf16.xpose.msra.mxu0 %v574_v21  ;;  %1347 = vmatpush3.bf16.xpose.msra.mxu1 %v620_v22 }
  0x67   :  { %1342 = vmatprep.mubr.msk.bf16.mxu0 %vm1675_vm0, %v1674_v0  ;;  %1348 = vmatprep.mubr.msk.bf16.mxu1 %vm1675_vm0, %v1674_v0 }
  0x68   :  { %1352 = vmatprep.subr.bf16.mxu0 %v1674_v0  ;;  %1358 = vmatprep.subr.bf16.mxu1 %v1674_v0 }
  0x6d   :  { %1343 = vmatmul.mubr.msk.bf16.vlgmr.msra.gmra.mrb[12].mxu0 %vm293_vm1, %v283_v23  ;;  %1349 = vmatmul.mubr.msk.bf16.vlgmr.msra.gmra.mrb[12].mxu1 %vm293_vm1, %v284_v24 }
  0x6e   :  { %1354 = vmatprep.mubr.msk.bf16.mxu0 %vm1675_vm0, %v1674_v0  ;;  %1360 = vmatprep.mubr.msk.bf16.mxu1 %vm1675_vm0, %v1674_v0 }
 0x128   :  { %v334_v25 = vpop.f32.mrb[0].mxu0  ;;  %v380_v26 = vpop.f32.mrb[0].mxu1 }
 0x129   :  { %v662_v27 = vmul.f32 0.17677669, %v334_v25  ;;  %v663_v28 = vmul.f32 0.17677669, %v380_v26  ;;  %v1308_v29 = vpop.f32.mrb[1].mxu0  ;;  %v1314_v30 = vpop.f32.mrb[1].mxu1 }
 0x12a   :  { %v337_v31 = vpop.f32.mrb[2].mxu0  ;;  %v383_v32 = vpop.f32.mrb[2].mxu1 }
 0x12b   :  { %v1309_v33 = vpop.f32.mrb[3].mxu0  ;;  %v674_v34 = vsel %vm670_vm2, %v663_v28, -inf  ;;  %v671_v35 = vsel %vm670_vm2, %v662_v27, -inf  ;;  %v1315_v36 = vpop.f32.mrb[3].mxu1 }
 0x12c   :  { %675 = vmax.xlane.f32.xlu1 %v674_v34  ;;  %672 = vmax.xlane.f32.xlu0 %v671_v35 }
 0x130   :  { %v426_v37 = vpop.f32.mrb[4].mxu0  ;;  %v472_v38 = vpop.f32.mrb[4].mxu1 }
 0x131   :  { %v1320_v39 = vpop.f32.mrb[5].mxu0  ;;  %v1326_v40 = vpop.f32.mrb[5].mxu1  ;;  %v664_v53 = vmul.f32 0.17677669, %v426_v37  ;;  %v665_v58 = vmul.f32 0.17677669, %v472_v38 }
 0x132   :  { %v429_v41 = vpop.f32.mrb[6].mxu0  ;;  %v475_v42 = vpop.f32.mrb[6].mxu1 }
 0x133   :  { %v1321_v43 = vpop.f32.mrb[7].mxu0  ;;  %v1327_v44 = vpop.f32.mrb[7].mxu1  ;;  %v677_v59 = vsel %vm670_vm2, %v664_v53, -inf  ;;  %v680_v5 = vsel %vm670_vm2, %v665_v58, -inf }
 0x138   :  { %v518_v45 = vpop.f32.mrb[8].mxu0  ;;  %v564_v46 = vpop.f32.mrb[8].mxu1 }
 0x139   :  { %v666_v47 = vmul.f32 0.17677669, %v518_v45  ;;  %v667_v48 = vmul.f32 0.17677669, %v564_v46  ;;  %v1332_v49 = vpop.f32.mrb[9].mxu0  ;;  %v1338_v50 = vpop.f32.mrb[9].mxu1 }
 0x13a   :  { %v521_v51 = vpop.f32.mrb[10].mxu0  ;;  %v567_v52 = vpop.f32.mrb[10].mxu1 }
 0x13b   :  { %v1333_v54 = vpop.f32.mrb[11].mxu0  ;;  %v686_v55 = vsel %vm670_vm2, %v667_v48, -inf  ;;  %v683_v56 = vsel %vm670_vm2, %v666_v47, -inf  ;;  %v1339_v57 = vpop.f32.mrb[11].mxu1  ;;  %v779_v52 = vld [vmem:[#allocation8 + $0x10] sm:$0xf] }
 0x13c   :  { %687 = vmax.xlane.f32.xlu1 %v686_v55  ;;  %684 = vmax.xlane.f32.xlu0 %v683_v56  ;;  %v82_v54 = vld [vmem:[%s2052_s4] sm:$0xf]  ;;  %v83_v55 = vld [vmem:[%s2052_s4 + $0x4] sm:$0xf]  ;;  %s1676_s4 = smov 32  }
 0x13d   :  { %v1252_v56 = vmul.f32 -5.0, %v82_v54  ;;  %v1253_v57 = vmul.f32 -5.0, %v83_v55 }
 0x140   :  { %678 = vmax.xlane.f32.xlu0 %v677_v59  ;;  %v610_v60 = vpop.f32.mrb[12].mxu0  ;;  %v656_v61 = vpop.f32.mrb[12].mxu1  ;;  %v90_v59 = vmul.f32 1.442695, %v1253_v57 }
 0x141   :  { %v668_v62 = vmul.f32 0.17677669, %v610_v60  ;;  %v669_v63 = vmul.f32 0.17677669, %v656_v61  ;;  %v1344_v1 = vpop.f32.mrb[13].mxu0  ;;  %v1350_v2 = vpop.f32.mrb[13].mxu1 }
 0x142   :  { %v613_v3 = vpop.f32.mrb[14].mxu0  ;;  %v659_v4 = vpop.f32.mrb[14].mxu1 }
 0x143   :  { %v689_v6 = vsel %vm670_vm2, %v668_v62, -inf  ;;  %v1345_v7 = vpop.f32.mrb[15].mxu0  ;;  %v1351_v8 = vpop.f32.mrb[15].mxu1  ;;  %v692_v9 = vsel %vm670_vm2, %v669_v63, -inf }
 0x144   :  { %681 = vmax.xlane.f32.xlu0 %v680_v5  ;;  %690 = vmax.xlane.f32.xlu1 %v689_v6 }
 0x148   :  { %693 = vmax.xlane.f32.xlu1 %v692_v9 }
 0x1b9   :  { %v676_v10 = vpop.xlane.xlu1 %675  ;;  %v673_v11 = vpop.xlane.xlu0 %672 }
 0x1ba   :  { %v696_v12 = vsub.f32 %v663_v28, %v676_v10  ;;  %v695_v13 = vsub.f32 %v662_v27, %v673_v11 }
 0x1bc   :  { %v703_v14 = vmul.f32 1.442695, %v695_v13  ;;  %v705_v15 = vmul.f32 1.442695, %v696_v12  ;;  %v117_v13 = vlaneseq }
 0x1be   :  { %1416 = vpow2.f32 %v703_v14  ;;  %v118_v14 = vshrl.u32 %v117_v13, 7 }
 0x1bf   :  { %1418 = vpow2.f32 %v705_v15 }
 0x1c0   :  { %v1884_v15 = vsub.s32 0, %v118_v14 }
 0x1c8   :  { %v1840_v16 = vpop.eup %1416 }
 0x1c9   :  { %v688_v17 = vpop.xlane.xlu1 %687  ;;  %v685_v18 = vpop.xlane.xlu0 %684  ;;  %v719_v21 = vsel %vm670_vm2, %v1840_v16, 0.0 }
 0x1ca   :  { %v700_v19 = vsub.f32 %v667_v48, %v688_v17  ;;  %v699_v20 = vsub.f32 %v666_v47, %v685_v18  ;;  %v1844_v22 = vpop.eup %1418  ;;  %720 = vadd.xlane.f32.xlu0 %v719_v21  ;;  %v775_v48 = vld [vmem:[#allocation8] sm:$0xf]  ;;  %v1886_v17 = vsub.s32 1, %v118_v14 }
 0x1cb   :  { %v722_v27 = vsel %vm670_vm2, %v1844_v22, 0.0  ;;  %v788_v50 = vsel %vm786_vm3, %v775_v48, 0 }
 0x1cc   :  { %v711_v23 = vmul.f32 1.442695, %v699_v20  ;;  %v713_v24 = vmul.f32 1.442695, %v700_v19  ;;  %1353 = vmatpush3.bf16.msra.mxu0 %v788_v50 }
 0x1cd   :  { %v679_v25 = vpop.xlane.xlu0 %678  ;;  %1364 = vmatprep.subr.bf16.mxu0 %v1674_v0 }
 0x1ce   :  { %v697_v26 = vsub.f32 %v664_v53, %v679_v25  ;;  %1420 = vpow2.f32 %v711_v23  ;;  %723 = vadd.xlane.f32.xlu0 %v722_v27  ;;  %v834_v53 = vsel %vm786_vm3, %v779_v52, 0  ;;  %v1896_v25 = vsub.s32 2, %v118_v14 }
 0x1cf   :  { %1422 = vpow2.f32 %v713_v24  ;;  %1359 = vmatpush3.bf16.msra.mxu1 %v834_v53 }
 0x1d0   :  { %v707_v28 = vmul.f32 1.442695, %v697_v26  ;;  %1370 = vmatprep.subr.bf16.mxu1 %v1674_v0 }
 0x1d1   :  { %v682_v29 = vpop.xlane.xlu0 %681  ;;  %v691_v30 = vpop.xlane.xlu1 %690 }
 0x1d2   :  { %1424 = vpow2.f32 %v707_v28  ;;  %v698_v31 = vsub.f32 %v665_v58, %v682_v29  ;;  %v701_v32 = vsub.f32 %v668_v62, %v691_v30  ;;  %v88_v58 = vmul.f32 1.442695, %v1252_v56  ;;  %v780_v56 = vld [vmem:[#allocation8 + $0x14] sm:$0xf] }
 0x1d3   :  { %v1901_v28 = vsub.s32 3, %v118_v14 }
 0x1d4   :  { %v709_v33 = vmul.f32 1.442695, %v698_v31  ;;  %v715_v34 = vmul.f32 1.442695, %v701_v32 }
 0x1d5   :  { %v694_v35 = vpop.xlane.xlu1 %693 }
 0x1d6   :  { %1426 = vpow2.f32 %v709_v33  ;;  %v702_v36 = vsub.f32 %v669_v63, %v694_v35 }
 0x1d7   :  { %1428 = vpow2.f32 %v715_v34 }
 0x1d8   :  { %v717_v37 = vmul.f32 1.442695, %v702_v36  ;;  %v1848_v38 = vpop.eup %1420 }
 0x1d9   :  { %v731_v39 = vsel %vm670_vm2, %v1848_v38, 0.0  ;;  %v1852_v40 = vpop.eup %1422 }
 0x1da   :  { %1430 = vpow2.f32 %v717_v37  ;;  %732 = vadd.xlane.f32.xlu1 %v731_v39  ;;  %v734_v43 = vsel %vm670_vm2, %v1852_v40, 0.0  ;;  %v776_v37 = vld [vmem:[#allocation8 + $0x4] sm:$0xf] }
 0x1db   :  { %1432 = vpow2.f32 %v88_v58 }
 0x1dc   :  { %v1854_v41 = vpop.eup %1424  ;;  %1434 = vpow2.f32 %v90_v59 }
 0x1dd   :  { %v725_v42 = vsel %vm670_vm2, %v1854_v41, 0.0 }
 0x1de   :  { %726 = vadd.xlane.f32.xlu0 %v725_v42  ;;  %735 = vadd.xlane.f32.xlu1 %v734_v43  ;;  %v880_v43 = vsel %vm786_vm3, %v776_v37, 0 }
 0x1e0   :  { %v1860_v44 = vpop.eup %1426 }
 0x1e1   :  { %v1862_v45 = vpop.eup %1428  ;;  %v728_v46 = vsel %vm670_vm2, %v1860_v44, 0.0 }
 0x1e2   :  { %729 = vadd.xlane.f32.xlu0 %v728_v46  ;;  %v737_v47 = vsel %vm670_vm2, %v1862_v45, 0.0 }
 0x1e3   :  { %738 = vadd.xlane.f32.xlu1 %v737_v47 }
 0x1e4   :  { %v1868_v49 = vpop.eup %1430 }
 0x1e5   :  { %v740_v51 = vsel %vm670_vm2, %v1868_v49, 0.0  ;;  %v1433_v60 = vpop.eup %1432 }
 0x1e6   :  { %v1435_v61 = vpop.eup %1434  ;;  %v92_v62 = vadd.f32 1.0, %v1433_v60 }
 0x1e7   :  { %741 = vadd.xlane.f32.xlu1 %v740_v51  ;;  %v93_v63 = vadd.f32 1.0, %v1435_v61  ;;  %v777_v51 = vld [vmem:[#allocation8 + $0x8] sm:$0xf]  ;;  %v926_v61 = vsel %vm786_vm3, %v780_v56, 0 }
 0x1e8   :  { %1436 = vrcp.f32 %v92_v62  ;;  %v778_v62 = vld [vmem:[#allocation8 + $0xc] sm:$0xf] }
 0x1e9   :  { %1438 = vrcp.f32 %v93_v63 }
 0x1f2   :  { %v1437_v1 = vpop.eup %1436 }
 0x1f3   :  { %v1439_v2 = vpop.eup %1438  ;;  %v98_v3 = vadd.f32 1e-05, %v1437_v1 }
 0x1f4   :  { %v99_v4 = vadd.f32 1e-05, %v1439_v2 }
 0x1f5   :  { %v100_v5 = vmul.f32 1.0986123, %v98_v3 }
 0x1f6   :  { %v101_v6 = vmul.f32 1.0986123, %v99_v4 }
 0x1f7   :  { %v102_v7 = vmul.f32 1.442695, %v100_v5 }
 0x1f8   :  { %v104_v8 = vmul.f32 1.442695, %v101_v6 }
 0x1f9   :  { %1440 = vpow2.f32 %v102_v7 }
 0x1fa   :  { %1442 = vpow2.f32 %v104_v8 }
 0x203   :  { %v1441_v9 = vpop.eup %1440 }
 0x204   :  { %v1443_v10 = vpop.eup %1442  ;;  %v1254_v11 = vadd.f32 -1.0, %v1441_v9 }
 0x205   :  { %v1255_v12 = vadd.f32 -1.0, %v1443_v10 }
 0x206   :  { %1444 = vrcp.f32 %v1254_v11  ;;  %109 = vst.msk [vmem:[#allocation14] sm:$0xf] %vm108_vm4, %v1254_v11 }
 0x207   :  { %1446 = vrcp.f32 %v1255_v12  ;;  %110 = vst.msk [vmem:[#allocation14 + $0x4] sm:$0xf] %vm108_vm4, %v1255_v12  ;;  %v782_v12 = vld [vmem:[#allocation8 + $0x1c] sm:$0xf] }
 0x208   :  { %v1110_v13 = vsel %vm786_vm3, %v782_v12, 0 }
 0x210   :  { %v1445_v18 = vpop.eup %1444 }
 0x211   :  { %v1888_v19 = vpop.eup %1446  ;;  %v115_v20 = vmul.f32 %v1445_v18, %v1445_v18  ;;  %v1905_v30 = vmul.f32 0.3989423, %v1445_v18 }
 0x212   :  { %v1892_v21 = vmul.f32 %v1888_v19, %v1888_v19 }
 0x213   :  { %v176_v23 = vrot.slane %v115_v20, %v1884_v15  ;;  %v183_v24 = vrot.slane %v115_v20, %v1886_v17  ;;  %v190_v27 = vrot.slane %v115_v20, %v1896_v25  ;;  %v197_v31 = vrot.slane %v115_v20, %v1901_v28 }
 0x214   :  { %v204_v26 = vrot.slane %v1892_v21, %v1884_v15  ;;  %v218_v29 = vrot.slane %v1892_v21, %v1896_v25  ;;  %v120_v32 = vrot.slane %v1905_v30, %v1884_v15  ;;  %v134_v34 = vrot.slane %v1905_v30, %v1896_v25 }
 0x215   :  { %178 = vbcast.lane.b32.xlu0 %v176_v23, 256  ;;  %185 = vbcast.lane.b32.xlu1 %v183_v24, 256  ;;  %v211_v14 = vrot.slane %v1892_v21, %v1886_v17  ;;  %v225_v20 = vrot.slane %v1892_v21, %v1901_v28  ;;  %v81_v21 = vld [vmem:[#allocation2] sm:$0xff] }
 0x219   :  { %206 = vbcast.lane.b32.xlu0 %v204_v26, 256  ;;  %192 = vbcast.lane.b32.xlu1 %v190_v27, 256 }
 0x21d   :  { %220 = vbcast.lane.b32.xlu0 %v218_v29, 256  ;;  %199 = vbcast.lane.b32.xlu1 %v197_v31, 256 }
 0x221   :  { %122 = vbcast.lane.b32.xlu0 %v120_v32, 256  ;;  %213 = vbcast.lane.b32.xlu1 %v211_v14, 256 }
 0x225   :  { %136 = vbcast.lane.b32.xlu0 %v134_v34, 256  ;;  %227 = vbcast.lane.b32.xlu1 %v225_v20, 256 }
 0x257   :  { %v721_v33 = vpop.xlane.xlu0 %720 }
 0x258   :  { %1448 = vrcp.f32 %v721_v33 }
 0x25b   :  { %v724_v35 = vpop.xlane.xlu0 %723 }
 0x25c   :  { %1450 = vrcp.f32 %v724_v35 }
 0x262   :  { %v1449_v36 = vpop.eup %1448 }
 0x263   :  { %v751_v39 = vmul.f32 %v1449_v36, %v1840_v16 }
 0x265   :  { %v759_v42 = vpack.c.bf16 %v751_v39, %v751_v39 }
 0x266   :  { %v1451_v46 = vpop.eup %1450 }
 0x267   :  { %v752_v47 = vmul.f32 %v1451_v46, %v1844_v22  ;;  %767 = vst.msk [vmem:[#allocation11] sm:$0xf] %vm108_vm4, %v759_v42  ;;  %1355 = vmatmul.mubr.msk.bf16.vlgmr.msra.gmra.mrb[16].mxu0 %vm670_vm2, %v759_v42  ;;  %v733_v48 = vpop.xlane.xlu1 %732  ;;  %v972_v22 = vsel %vm786_vm3, %v777_v51, 0 }
 0x268   :  { %1452 = vrcp.f32 %v733_v48  ;;  %1365 = vmatpush3.bf16.msra.mxu0 %v880_v43  ;;  %1366 = vmatprep.mubr.msk.bf16.mxu0 %vm1675_vm0, %v1674_v0 }
 0x269   :  { %v760_v50 = vpack.c.bf16 %v752_v47, %v752_v47  ;;  %1376 = vmatprep.subr.bf16.mxu0 %v1674_v0 }
 0x26b   :  { %v727_v16 = vpop.xlane.xlu0 %726  ;;  %v736_v52 = vpop.xlane.xlu1 %735  ;;  %768 = vst.msk [vmem:[#allocation11 + $0x4] sm:$0xf] %vm108_vm4, %v760_v50 }
 0x26c   :  { %1454 = vrcp.f32 %v727_v16 }
 0x26d   :  { %1456 = vrcp.f32 %v736_v52 }
 0x26f   :  { %v730_v53 = vpop.xlane.xlu0 %729  ;;  %1367 = vmatmul.mubr.msk.bf16.vlgmr.msra.gmra.mrb[20].mxu0 %vm670_vm2, %v760_v50 }
 0x270   :  { %1458 = vrcp.f32 %v730_v53  ;;  %v739_v54 = vpop.xlane.xlu1 %738  ;;  %1377 = vmatpush3.bf16.msra.mxu0 %v972_v22  ;;  %1378 = vmatprep.mubr.msk.bf16.mxu0 %vm1675_vm0, %v1674_v0 }
 0x271   :  { %1460 = vrcp.f32 %v739_v54  ;;  %1388 = vmatprep.subr.bf16.mxu0 %v1674_v0 }
 0x272   :  { %v1453_v55 = vpop.eup %1452 }
 0x273   :  { %v755_v57 = vmul.f32 %v1453_v55, %v1848_v38  ;;  %v1064_v38 = vsel %vm786_vm3, %v778_v62, 0 }
 0x274   :  { %v742_v58 = vpop.xlane.xlu1 %741 }
 0x275   :  { %1462 = vrcp.f32 %v742_v58  ;;  %v763_v60 = vpack.c.bf16 %v755_v57, %v755_v57 }
 0x276   :  { %v1455_v59 = vpop.eup %1454 }
 0x277   :  { %v1457_v63 = vpop.eup %1456  ;;  %v753_v1 = vmul.f32 %v1455_v59, %v1854_v41  ;;  %771 = vst.msk [vmem:[#allocation11 + $0x10] sm:$0xf] %vm108_vm4, %v763_v60  ;;  %1361 = vmatmul.mubr.msk.bf16.vlgmr.msra.gmra.mrb[16].mxu1 %vm670_vm2, %v763_v60 }
 0x278   :  { %v756_v2 = vmul.f32 %v1457_v63, %v1852_v40  ;;  %1371 = vmatpush3.bf16.msra.mxu1 %v926_v61  ;;  %1372 = vmatprep.mubr.msk.bf16.mxu1 %vm1675_vm0, %v1674_v0  ;;  %v781_v40 = vld [vmem:[#allocation8 + $0x18] sm:$0xf] }
 0x279   :  { %v761_v3 = vpack.c.bf16 %v753_v1, %v753_v1  ;;  %1382 = vmatprep.subr.bf16.mxu1 %v1674_v0  ;;  %v1018_v9 = vsel %vm786_vm3, %v781_v40, 0 }
 0x27a   :  { %v1459_v4 = vpop.eup %1458  ;;  %v764_v5 = vpack.c.bf16 %v756_v2, %v756_v2 }
 0x27b   :  { %v1461_v6 = vpop.eup %1460  ;;  %v754_v41 = vmul.f32 %v1459_v4, %v1860_v44  ;;  %769 = vst.msk [vmem:[#allocation11 + $0x8] sm:$0xf] %vm108_vm4, %v761_v3  ;;  %1379 = vmatmul.mubr.msk.bf16.vlgmr.msra.gmra.mrb[24].mxu0 %vm670_vm2, %v761_v3 }
 0x27c   :  { %v757_v7 = vmul.f32 %v1461_v6, %v1862_v45  ;;  %772 = vst.msk [vmem:[#allocation11 + $0x14] sm:$0xf] %vm108_vm4, %v764_v5  ;;  %1389 = vmatpush3.bf16.msra.mxu0 %v1064_v38  ;;  %1390 = vmatprep.mubr.msk.bf16.mxu0 %vm1675_vm0, %v1674_v0 }
 0x27d   :  { %v762_v8 = vpack.c.bf16 %v754_v41, %v754_v41 }
 0x27e   :  { %v765_v10 = vpack.c.bf16 %v757_v7, %v757_v7 }
 0x27f   :  { %v1463_v11 = vpop.eup %1462  ;;  %770 = vst.msk [vmem:[#allocation11 + $0xc] sm:$0xf] %vm108_vm4, %v762_v8  ;;  %1373 = vmatmul.mubr.msk.bf16.vlgmr.msra.gmra.mrb[20].mxu1 %vm670_vm2, %v764_v5 }
 0x280   :  { %v758_v44 = vmul.f32 %v1463_v11, %v1868_v49  ;;  %773 = vst.msk [vmem:[#allocation11 + $0x18] sm:$0xf] %vm108_vm4, %v765_v10  ;;  %1383 = vmatpush3.bf16.msra.mxu1 %v1018_v9  ;;  %1384 = vmatprep.mubr.msk.bf16.mxu1 %vm1675_vm0, %v1674_v0  ;;  %v114_v49 = vmul.f32 0.3989423, %v1888_v19  ;;  %v141_v19 = vrot.slane %v1905_v30, %v1901_v28 }
 0x281   :  { %1394 = vmatprep.subr.bf16.mxu1 %v1674_v0 }
 0x282   :  { %v766_v45 = vpack.c.bf16 %v758_v44, %v758_v44  ;;  %v148_v18 = vrot.slane %v114_v49, %v1884_v15  ;;  %v162_v23 = vrot.slane %v114_v49, %v1896_v25  ;;  %v155_v24 = vrot.slane %v114_v49, %v1886_v17 }
 0x283   :  { %1391 = vmatmul.mubr.msk.bf16.vlgmr.msra.gmra.mrb[28].mxu0 %vm670_vm2, %v762_v8  ;;  %v169_v15 = vrot.slane %v114_v49, %v1901_v28 }
 0x284   :  { %774 = vst.msk [vmem:[#allocation11 + $0x1c] sm:$0xf] %vm108_vm4, %v766_v45  ;;  %150 = vbcast.lane.b32.xlu0 %v148_v18, 256 }
 0x287   :  { %1385 = vmatmul.mubr.msk.bf16.vlgmr.msra.gmra.mrb[24].mxu1 %vm670_vm2, %v765_v10  ;;  %v179_v26 = vpop.permute.xlu0 %178  ;;  %v186_v27 = vpop.permute.xlu1 %185 }
 0x288   :  { %1395 = vmatpush3.bf16.msra.mxu1 %v1110_v13  ;;  %1396 = vmatprep.mubr.msk.bf16.mxu1 %vm1675_vm0, %v1674_v0  ;;  %v127_v0 = vrot.slane %v1905_v30, %v1886_v17  ;;  %v229_v25 = vmul.f32 %v179_v26, %v81_v21  ;;  %v230_v50 = vmul.f32 %v186_v27, %v81_v21 }
 0x289   :  { %164 = vbcast.lane.b32.xlu0 %v162_v23, 256 }
 0x28a   :  { %129 = vbcast.lane.b32.xlu1 %v127_v0, 256  ;;  %v237_v29 = vmul.f32 1.442695, %v229_v25  ;;  %v239_v52 = vmul.f32 1.442695, %v230_v50 }
 0x28b   :  { %v207_v31 = vpop.permute.xlu0 %206  ;;  %v193_v32 = vpop.permute.xlu1 %192 }
 0x28c   :  { %1464 = vpow2.f32 %v237_v29  ;;  %v231_v33 = vmul.f32 %v193_v32, %v81_v21  ;;  %v233_v46 = vmul.f32 %v207_v31, %v81_v21 }
 0x28e   :  { %143 = vbcast.lane.b32.xlu1 %v141_v19, 256  ;;  %v241_v34 = vmul.f32 1.442695, %v231_v33  ;;  %v245_v47 = vmul.f32 1.442695, %v233_v46 }
 0x28f   :  { %1397 = vmatmul.mubr.msk.bf16.vlgmr.msra.gmra.mrb[28].mxu1 %vm670_vm2, %v766_v45  ;;  %v221_v35 = vpop.permute.xlu0 %220  ;;  %v200_v51 = vpop.permute.xlu1 %199 }
 0x290   :  { %1466 = vpow2.f32 %v241_v34  ;;  %v235_v48 = vmul.f32 %v221_v35, %v81_v21  ;;  %v232_v22 = vmul.f32 %v200_v51, %v81_v21 }
 0x291   :  { %1468 = vpow2.f32 %v245_v47 }
 0x292   :  { %157 = vbcast.lane.b32.xlu1 %v155_v24, 256  ;;  %v249_v16 = vmul.f32 1.442695, %v235_v48  ;;  %v243_v53 = vmul.f32 1.442695, %v232_v22 }
 0x293   :  { %v123_v30 = vpop.permute.xlu0 %122  ;;  %v214_v55 = vpop.permute.xlu1 %213 }
 0x294   :  { %1470 = vpow2.f32 %v249_v16  ;;  %v234_v57 = vmul.f32 %v214_v55, %v81_v21 }
 0x295   :  { %1472 = vpow2.f32 %v239_v52 }
 0x296   :  { %171 = vbcast.lane.b32.xlu1 %v169_v15, 256  ;;  %v1465_v36 = vpop.eup %1464  ;;  %1474 = vpow2.f32 %v243_v53  ;;  %v247_v60 = vmul.f32 1.442695, %v234_v57 }
 0x297   :  { %v253_v37 = vmul.f32 %v1465_v36, %v123_v30  ;;  %v137_v28 = vpop.permute.xlu0 %136  ;;  %v228_v62 = vpop.permute.xlu1 %227 }
 0x298   :  { %1476 = vpow2.f32 %v247_v60  ;;  %v236_v1 = vmul.f32 %v228_v62, %v81_v21 }
 0x299   :  { %v261_v17 = vpack.c.bf16 %v253_v37, %v253_v37 }
 0x29a   :  { %v1467_v39 = vpop.eup %1466  ;;  %v251_v38 = vmul.f32 1.442695, %v236_v1 }
 0x29b   :  { %269 = vst.msk [vmem:[#allocation13] sm:$0xf] %vm108_vm4, %v261_v17  ;;  %v255_v42 = vmul.f32 %v1467_v39, %v137_v28  ;;  %v1469_v54 = vpop.eup %1468 }
 0x29c   :  { %1478 = vpow2.f32 %v251_v38 }
 0x29d   :  { %v263_v43 = vpack.c.bf16 %v255_v42, %v255_v42 }
 0x29e   :  { %v1471_v59 = vpop.eup %1470 }
 0x29f   :  { %271 = vst.msk [vmem:[#allocation13 + $0x8] sm:$0xf] %vm108_vm4, %v263_v43  ;;  %v1473_v3 = vpop.eup %1472 }
 0x2a0   :  { %v1475_v41 = vpop.eup %1474 }
 0x2a2   :  { %v1477_v11 = vpop.eup %1476 }
 0x2a6   :  { %v1479_v14 = vpop.eup %1478 }
 0x2f6   :  { %v151_v56 = vpop.permute.xlu0 %150 }
 0x2f7   :  { %v257_v58 = vmul.f32 %v1469_v54, %v151_v56 }
 0x2f9   :  { %v265_v61 = vpack.c.bf16 %v257_v58, %v257_v58 }
 0x2fb   :  { %v165_v63 = vpop.permute.xlu0 %164  ;;  %273 = vst.msk [vmem:[#allocation13 + $0x10] sm:$0xf] %vm108_vm4, %v265_v61 }
 0x2fc   :  { %v259_v2 = vmul.f32 %v1471_v59, %v165_v63  ;;  %v130_v5 = vpop.permute.xlu1 %129 }
 0x2fd   :  { %v254_v6 = vmul.f32 %v1473_v3, %v130_v5 }
 0x2fe   :  { %v267_v4 = vpack.c.bf16 %v259_v2, %v259_v2 }
 0x2ff   :  { %v262_v40 = vpack.c.bf16 %v254_v6, %v254_v6 }
 0x300   :  { %275 = vst.msk [vmem:[#allocation13 + $0x18] sm:$0xf] %vm108_vm4, %v267_v4  ;;  %v144_v7 = vpop.permute.xlu1 %143 }
 0x301   :  { %270 = vst.msk [vmem:[#allocation13 + $0x4] sm:$0xf] %vm108_vm4, %v262_v40  ;;  %v256_v9 = vmul.f32 %v1475_v41, %v144_v7 }
 0x303   :  { %v264_v45 = vpack.c.bf16 %v256_v9, %v256_v9 }
 0x304   :  { %v158_v13 = vpop.permute.xlu1 %157 }
 0x305   :  { %272 = vst.msk [vmem:[#allocation13 + $0xc] sm:$0xf] %vm108_vm4, %v264_v45  ;;  %v258_v49 = vmul.f32 %v1477_v11, %v158_v13 }
 0x307   :  { %v266_v18 = vpack.c.bf16 %v258_v49, %v258_v49 }
 0x308   :  { %v172_v20 = vpop.permute.xlu1 %171 }
 0x309   :  { %274 = vst.msk [vmem:[#allocation13 + $0x14] sm:$0xf] %vm108_vm4, %v266_v18  ;;  %v260_v0 = vmul.f32 %v1479_v14, %v172_v20 }
 0x30b   :  { %v268_v15 = vpack.c.bf16 %v260_v0, %v260_v0 }
 0x30d   :  { %276 = vst.msk [vmem:[#allocation13 + $0x1c] sm:$0xf] %vm108_vm4, %v268_v15 }
 0x33a   :  { %v1975_v8 = vpop.f32.mrb[16].mxu0 }
 0x33b   :  { %v1356_v10 = vpop.f32.mrb[17].mxu0 }
 0x33c   :  { %v827_v44 = vpop.f32.mrb[18].mxu0 }
 0x33d   :  { %v1357_v12 = vpop.f32.mrb[19].mxu0 }
 0x342   :  { %v916_v23 = vpop.f32.mrb[20].mxu0 }
 0x343   :  { %v1368_v19 = vpop.f32.mrb[21].mxu0  ;;  %1154 = vrot.lane.b32.xlu0 %v916_v23, %s1676_s4 }
 0x344   :  { %v919_v24 = vpop.f32.mrb[22].mxu0 }
 0x345   :  { %v1369_v26 = vpop.f32.mrb[23].mxu0 }
 0x34a   :  { %v1981_v21 = vpop.f32.mrb[16].mxu1 }
 0x34b   :  { %v1362_v27 = vpop.f32.mrb[17].mxu1 }
 0x34c   :  { %v873_v25 = vpop.f32.mrb[18].mxu1 }
 0x34d   :  { %v1363_v29 = vpop.f32.mrb[19].mxu1 }
 0x34e   :  { %v1008_v31 = vpop.f32.mrb[24].mxu0 }
 0x34f   :  { %v1380_v32 = vpop.f32.mrb[25].mxu0  ;;  %1162 = vrot.lane.b32.xlu0 %v1008_v31, %s1669_s15 }
 0x350   :  { %v1011_v33 = vpop.f32.mrb[26].mxu0 }
 0x351   :  { %v1381_v34 = vpop.f32.mrb[27].mxu0 }
 0x352   :  { %v962_v35 = vpop.f32.mrb[20].mxu1 }
 0x353   :  { %v1374_v30 = vpop.f32.mrb[21].mxu1  ;;  %1156 = vrot.lane.b32.xlu1 %v962_v35, %s1676_s4 }
 0x354   :  { %v965_v36 = vpop.f32.mrb[22].mxu1 }
 0x355   :  { %v1375_v37 = vpop.f32.mrb[23].mxu1 }
 0x356   :  { %v1100_v17 = vpop.f32.mrb[28].mxu0 }
 0x357   :  { %v1392_v39 = vpop.f32.mrb[29].mxu0  ;;  %1170 = vrot.lane.b32.xlu0 %v1100_v17, %s1678_s14 }
 0x358   :  { %v1103_v28 = vpop.f32.mrb[30].mxu0 }
 0x359   :  { %1579 = shalt.err (!%p1576_p8)
}
 0x35a   :  { %s1580_s0 = scalar_lea.hbm %s2054_s6, 512 }
 0x35b   :  { %p1581_p9 = scmp.ne.s32.totalorder %s2054_s6, %s1580_s0  ;;  %p1584_p10 = scmp.lt.u32.totalorder %s1580_s0, %s2054_s6 }
 0x35d   :  { %p1586_p11 = pnand %p1584_p10, %p1581_p9 }
 0x35f   :  { %1589 = shalt.err (!%p1586_p11)
}
 0x360   :  { %1209 = dma.vmem_to_hbm [thread:$0]  %s1204_s13, 512, %s2054_s6, [#allocation12], %s1669_s15, %s1669_s15, %s1670_s16   ;;  %v1393_v42 = vpop.f32.mrb[31].mxu0  ;;  %v1054_v43 = vpop.f32.mrb[24].mxu1 }
 0x361   :  { %s1679_s27 = smov [#allocation13]   ;;  %v1386_v46 = vpop.f32.mrb[25].mxu1  ;;  %1164 = vrot.lane.b32.xlu1 %v1054_v43, %s1669_s15  ;;  %s1680_s30 = smov [#allocation14]  }
 0x362   :  { %s1215_s29 = sshll.u32 %s1679_s27, 4  ;;  %s1227_s1 = sshll.u32 %s1680_s30, 4  ;;  %v1057_v47 = vpop.f32.mrb[26].mxu1  ;;  %s1216_s29 = int_to_ptr.vmem [resolvable:$true] %s1215_s29  ;;  %s1228_s1 = int_to_ptr.vmem [resolvable:$true] %s1227_s1 }
 0x363   :  { %s1590_s28 = scalar_lea.vmem %s1216_s29, 512  ;;  %p1595_p13 = scmp.lt.s32.totalorder %s1216_s29, %s1216_s29 }
 0x364   :  { %p1591_p12 = scmp.ne.s32.totalorder %s1216_s29, %s1590_s28  ;;  %p1596_p0 = scmp.lt.s32.totalorder %s1590_s28, %s1590_s28 }
 0x366   :  { %p1597_p1 = por %p1596_p0, %p1595_p13 }
 0x368   :  { %p1598_p2 = pnand %p1597_p1, %p1591_p12 }
 0x36a   :  { %1601 = shalt.err (!%p1598_p2)
}
 0x36b   :  { %s1602_s22 = scalar_lea.hbm %s2055_s7, 512 }
 0x36c   :  { %p1603_p3 = scmp.ne.s32.totalorder %s2055_s7, %s1602_s22  ;;  %p1606_p4 = scmp.lt.u32.totalorder %s1602_s22, %s2055_s7 }
 0x36e   :  { %p1608_p5 = pnand %p1606_p4, %p1603_p3 }
 0x370   :  { %1611 = shalt.err (!%p1608_p5)
}
 0x371   :  { %1221 = dma.vmem_to_hbm [thread:$0]  %s1216_s29, 512, %s2055_s7, [#allocation12], %s1669_s15, %s1669_s15, %s1670_s16   ;;  %v1387_v48 = vpop.f32.mrb[27].mxu1 }
 0x372   :  { %s1612_s13 = scalar_lea.vmem %s1228_s1, 128  ;;  %p1617_p7 = scmp.lt.s32.totalorder %s1228_s1, %s1228_s1 }
 0x373   :  { %p1613_p6 = scmp.ne.s32.totalorder %s1228_s1, %s1612_s13  ;;  %p1618_p8 = scmp.lt.s32.totalorder %s1612_s13, %s1612_s13 }
 0x375   :  { %p1619_p9 = por %p1618_p8, %p1617_p7 }
 0x377   :  { %p1620_p10 = pnand %p1619_p9, %p1613_p6 }
 0x379   :  { %1623 = shalt.err (!%p1620_p10)
}
 0x37a   :  { %s1624_s19 = scalar_lea.hbm %s2056_s8, 128 }
 0x37b   :  { %p1625_p11 = scmp.ne.s32.totalorder %s2056_s8, %s1624_s19  ;;  %p1628_p12 = scmp.lt.u32.totalorder %s1624_s19, %s2056_s8 }
 0x37d   :  { %p1630_p13 = pnand %p1628_p12, %p1625_p11 }
 0x37f   :  { %1633 = shalt.err (!%p1630_p13)
}
 0x380   :  { %1233 = dma.vmem_to_hbm [thread:$0]  %s1228_s1, 128, %s2056_s8, [#allocation15], %s1669_s15, %s1669_s15, %s1670_s16   ;;  %v1146_v50 = vpop.f32.mrb[28].mxu1  ;;  %vm1178_vm5 = vcmask 523264   ;;  %vm1181_vm6 = vcmask 785408  }
 0x381   :  { %v1398_v16 = vpop.f32.mrb[29].mxu1  ;;  %1172 = vrot.lane.b32.xlu1 %v1146_v50, %s1678_s14  ;;  %s1681_s8 = smov [#allocation10]  }
 0x382   :  { %v1149_v51 = vpop.f32.mrb[30].mxu1  ;;  %s1191_s15 = sshll.u32 %s1681_s8, 4  ;;  %s1192_s15 = int_to_ptr.vmem [resolvable:$true] %s1191_s15 }
 0x383   :  { %v1399_v52 = vpop.f32.mrb[31].mxu1  ;;  %s1634_s16 = scalar_lea.vmem %s1192_s15, 256  ;;  %p1639_p1 = scmp.lt.s32.totalorder %s1192_s15, %s1192_s15 }
 0x384   :  { %p1635_p0 = scmp.ne.s32.totalorder %s1192_s15, %s1634_s16  ;;  %p1640_p2 = scmp.lt.s32.totalorder %s1634_s16, %s1634_s16 }
 0x386   :  { %p1641_p3 = por %p1640_p2, %p1639_p1 }
 0x388   :  { %p1642_p4 = pnand %p1641_p3, %p1635_p0 }
 0x3b5   :  { %v1155_v22 = vpop.permute.xlu0 %1154 }
 0x3b6   :  { %v1176_v54 = vsel %vm293_vm1, %v1975_v8, %v1155_v22 }
 0x3c1   :  { %v1163_v53 = vpop.permute.xlu0 %1162 }
 0x3c2   :  { %v1179_v55 = vsel %vm1178_vm5, %v1176_v54, %v1163_v53 }
 0x3c5   :  { %v1157_v58 = vpop.permute.xlu1 %1156 }
 0x3c6   :  { %v1177_v60 = vsel %vm293_vm1, %v1981_v21, %v1157_v58 }
 0x3c9   :  { %v1171_v56 = vpop.permute.xlu0 %1170 }
 0x3ca   :  { %v1182_v57 = vsel %vm1181_vm6, %v1179_v55, %v1171_v56 }
 0x3cb   :  { %1184 = vst [vmem:[#allocation10] sm:$0xff] %v1182_v57 }
 0x3d3   :  { %v1165_v59 = vpop.permute.xlu1 %1164 }
 0x3d4   :  { %v1180_v61 = vsel %vm1178_vm5, %v1177_v60, %v1165_v59 }
 0x3f3   :  { %v1173_v62 = vpop.permute.xlu1 %1172 }
 0x3f4   :  { %v1183_v63 = vsel %vm1181_vm6, %v1180_v61, %v1173_v62 }
 0x3f5   :  { %1185 = vst [vmem:[#allocation10 + $0x8] sm:$0xff] %v1183_v63 }
 0x3f6   :  { %1645 = shalt.err (!%p1642_p4)
}
 0x3f7   :  { %s1646_s26 = scalar_lea.hbm %s2053_s5, 256 }
 0x3f8   :  { %p1647_p5 = scmp.ne.s32.totalorder %s2053_s5, %s1646_s26  ;;  %p1650_p6 = scmp.lt.u32.totalorder %s1646_s26, %s2053_s5 }
 0x3fa   :  { %p1652_p7 = pnand %p1650_p6, %p1647_p5 }
 0x3fc   :  { %1655 = shalt.err (!%p1652_p7)
}
 0x3fd   :  { %s1682_s28 = smov 128   ;;  %s1683_s2 = smov 8  }
 0x3fe   :  { %1197 = dma.vmem_to_hbm [thread:$0]  %s1192_s15, 256, %s2053_s5, [#allocation4], %s1682_s28, %s1682_s28, %s1683_s2  }
 0x3ff   :  { %1662 = dma.done.wait [#allocation4], 256  }
 0x400   :  { %1663 = vsyncadd [#allocation4], 4294967040 }
 0x401   :  { %1664 = dma.done.wait [#allocation12], 1024  }
 0x402   :  { %1665 = vsyncadd [#allocation12], 4294966272 }
 0x403   :  { %1666 = dma.done.wait [#allocation15], 128  }
 0x404   :  { %1667 = vsyncadd [#allocation15], 4294967168 }
 0x405   :  { %1246 = vsyncpa [#allocation3], 1 }
 0x406   :  { %1247 = vsyncpa [#allocation6], 1 }
 0x407   :  { %1248 = vsyncpa [#allocation9], 1 }
 0x408   :  { %1249 = vsyncpa [#allocation4], 1 }
 0x409   :  { %1250 = vsyncpa [#allocation12], 1 }
 0x40a   :  { %1251 = vsyncpa [#allocation15], 1 }

</bundles_post_ra>
